<compile_context>
chip_gen: v7x
topology: tpu7x:2x2x1
jax: 0.10.0
libtpu: 0.0.40
codegen_flags: <defaults>
</compile_context>

<pallas_src>
import jax
import jax.numpy as jnp
from jax.experimental import pallas as pl
from jax.experimental.pallas import tpu as pltpu


_LANE = 128
_PER_PAIR_BUDGET = 16 * 1024 * 1024   # padded (in + out) bytes per pipeline stage
_VMEM_LIMIT = 48 * 1024 * 1024        # 2x double-buffered pair (<=32 MiB) + headroom


def _sublane(dtype) -> int:
    # Sublane packing granularity: 8 rows for 4-byte, 16 for 2-byte, 32 for 1-byte.
    itemsize = jnp.dtype(dtype).itemsize
    return max(8, 32 // max(1, itemsize))


def _round_up(x, m):
    return ((x + m - 1) // m) * m


def _padded_plane_bytes(rows, cols, dtype):
    itemsize = jnp.dtype(dtype).itemsize
    return _round_up(rows, _sublane(dtype)) * _round_up(cols, _LANE) * itemsize


def _crop_kernel(x_ref, o_ref):
    # x_ref: (cb, hb_in, w) VMEM tile; o_ref: (cb, hb_out, w_out) VMEM tile.
    # Static top-left crop -> pure vector load/store, no compute.
    _, hb_out, wb_out = o_ref.shape
    o_ref[...] = x_ref[:, :hb_out, :wb_out]


def same_pad_2d(x, kernel_size, *, block_channels=None, block_rows=None,
                force_pallas=False):
    """Pallas implementation of SamePad2d.forward (NCHW layout)."""
    assert x.ndim == 4, "SamePad2d expects a 4-D NCHW tensor"
    remove = 1 if kernel_size % 2 == 0 else 0
    if remove == 0:
        # Identity path: no kernel, no HBM round-trip.
        return x

    n, c, h, w = x.shape
    h_out, w_out = h - remove, w - remove
    if h_out <= 0 or w_out <= 0:
        return x[:, :, :h_out, :w_out]

    itemsize = jnp.dtype(x.dtype).itemsize
    total_bytes = n * c * (h * w + h_out * w_out) * itemsize

    # Fast path: for narrow outputs (< 128 lanes) or tiny planes, the Pallas
    # output stores are masked partial vst's and most of the DMA is padding;
    # the fused XLA slice is strictly better there.
    if not force_pallas and (w_out < _LANE or total_bytes < (1 << 20)):
        return x[:, :, :h_out, :w_out]

    nc = n * c
    x_flat = x.reshape(nc, h, w)

    sub = _sublane(x.dtype)
    in_plane = _padded_plane_bytes(h, w, x.dtype)
    out_plane = _padded_plane_bytes(h_out, w_out, x.dtype)
    pair_plane = in_plane + out_plane  # padded bytes for ONE (in+out) plane pair

    use_h_blocking = h_out >= sub and (
        block_rows is not None or pair_plane > _PER_PAIR_BUDGET
    )

    if not use_h_blocking:
        # Channel-blocked: each grid step moves a multi-plane slab, full
        # spatial extent in the last two dims (satisfies the (8,128) rule).
        cb = max(1, min(nc, _PER_PAIR_BUDGET // max(1, pair_plane)))
        if nc >= 2:
            # Keep >= 2 grid steps so the parallel axis shards across both
            # TensorCores on v7x.
            cb = min(cb, pl.cdiv(nc, 2))
        if block_channels is not None:
            cb = max(1, min(nc, block_channels))
        grid = (pl.cdiv(nc, cb),)
        in_specs = [pl.BlockSpec((cb, h, w), lambda i: (i, 0, 0))]
        out_specs = pl.BlockSpec((cb, h_out, w_out), lambda i: (i, 0, 0))
        semantics = ("parallel",)
    else:
        # One plane pair is too large for the budget (or caller forced it):
        # tile H with a multiple-of-sublane row block; output row block j maps
        # to input row block j, so the crop composes block-by-block.
        if block_rows is not None:
            hb = block_rows
        else:
            per_row_bytes = (_round_up(w, _LANE) + _round_up(w_out, _LANE)) * itemsize
            hb = _PER_PAIR_BUDGET // max(1, per_row_bytes)
        hb = min(hb, h_out)
        hb = max(sub, (hb // sub) * sub)
        grid = (nc, pl.cdiv(h_out, hb))
        in_specs = [pl.BlockSpec((1, hb, w), lambda i, j: (i, j, 0))]
        out_specs = pl.BlockSpec((1, hb, w_out), lambda i, j: (i, j, 0))
        semantics = ("parallel", "parallel")

    out_flat = pl.pallas_call(
        _crop_kernel,
        out_shape=jax.ShapeDtypeStruct((nc, h_out, w_out), x.dtype),
        grid=grid,
        in_specs=in_specs,
        out_specs=out_specs,
        compiler_params=pltpu.CompilerParams(
            dimension_semantics=semantics,
            vmem_limit_bytes=_VMEM_LIMIT,
        ),
        cost_estimate=pl.CostEstimate(
            flops=0, transcendentals=0, bytes_accessed=total_bytes
        ),
    )(x_flat)

    return out_flat.reshape(n, c, h_out, w_out)


if __name__ == "__main__":
    key = jax.random.PRNGKey(0)
    x = jax.random.normal(key, (2, 4, 16, 16), dtype=jnp.float32)
    ref = x[:, :, :-1, :-1]

    # Even kernel_size, default wrapper: tiny W -> XLA slice fast path.
    out = jax.block_until_ready(same_pad_2d(x, kernel_size=2))
    assert out.shape == (2, 4, 15, 15)
    assert jnp.array_equal(out, ref)

    # Force the Pallas channel-blocked path.
    out_p = jax.block_until_ready(same_pad_2d(x, kernel_size=2, force_pallas=True))
    assert jnp.array_equal(out_p, ref)

    # Channel block that does not divide N*C (exercise partial last block).
    out_pb = jax.block_until_ready(
        same_pad_2d(x, kernel_size=2, force_pallas=True, block_channels=3)
    )
    assert jnp.array_equal(out_pb, ref)

    # Force the H-blocked path (exercise partial last row block).
    out_h = jax.block_until_ready(
        same_pad_2d(x, kernel_size=2, force_pallas=True, block_rows=8)
    )
    assert jnp.array_equal(out_h, ref)

    # Odd kernel_size -> identity (no pallas_call launched).
    out_id = jax.block_until_ready(same_pad_2d(x, kernel_size=3))
    assert out_id.shape == (2, 4, 16, 16)
    assert jnp.array_equal(out_id, x)

    print("KERNEL_OK")
</pallas_src>

<mosaic_0001>
module attributes {stable_mosaic.version = 11 : i64} {
  func.func @_crop_kernel(%arg0: i32, %arg1: memref<4x16x16xf32, #tpu.memory_space<vmem>>, %arg2: memref<4x15x15xf32, #tpu.memory_space<vmem>>) attributes {dimension_semantics = [#tpu.dimension_semantics<parallel>], iteration_bounds = array<i64: 2>, scalar_prefetch = 0 : i64, scratch_operands = 0 : i64, tpu.core_type = #tpu.core_type<tc>, window_params = [{transform_indices = @transform_0, window_bounds = array<i64: 4, 16, 16>}, {transform_indices = @transform_1, window_bounds = array<i64: 4, 15, 15>}]} {
    %c0 = arith.constant 0 : index
    %c0_0 = arith.constant 0 : index
    %c0_1 = arith.constant 0 : index
    %0 = vector.load %arg1[%c0, %c0_0, %c0_1] : memref<4x16x16xf32, #tpu.memory_space<vmem>>, vector<4x15x15xf32>
    %c0_2 = arith.constant 0 : index
    %c0_3 = arith.constant 0 : index
    %c0_4 = arith.constant 0 : index
    %1 = vector.load %arg2[%c0_2, %c0_3, %c0_4] : memref<4x15x15xf32, #tpu.memory_space<vmem>>, vector<4x15x15xf32>
    tpu.vector_store %arg2[%c0_2, %c0_3, %c0_4], %0 {strides = array<i32>} : memref<4x15x15xf32, #tpu.memory_space<vmem>>, vector<4x15x15xf32>,
    return
  }
  func.func @transform_0(%arg0: i32) -> (i32, i32, i32) {
    %c0_i32 = arith.constant 0 : i32
    %c0_i32_0 = arith.constant 0 : i32
    %c0_i32_1 = arith.constant 0 : i32
    return %arg0, %c0_i32, %c0_i32_0 : i32, i32, i32
  }
  func.func @transform_1(%arg0: i32) -> (i32, i32, i32) {
    %c0_i32 = arith.constant 0 : i32
    %c0_i32_0 = arith.constant 0 : i32
    %c0_i32_1 = arith.constant 0 : i32
    return %arg0, %c0_i32, %c0_i32_0 : i32, i32, i32
  }
}

</mosaic_0001>

<bundles_post_ra>
// kernel: tpu_custom_call.1
= control target key start
LH: loop header
LB: loop body
LE: loop exit
PB: predicated region body
PF: predicated region fallthrough
CT: control target
= control target key end

     0   :  { %6 = vsyncpa [#allocation3], 0  ;;  %s482_s0 = inlined_call_operand.hbm [shape: f32[8,16,16], index: 0, kind: input, shape index: {}]   ;;  %s483_s1 = inlined_call_operand.vmem [shape: f32[8,15,15], index: 1, kind: output, shape index: {}]  }
   0x1   :  { %8 = vsyncpa [#allocation3 + $0x1], 0  ;;  %s367_s6 = smov 0   ;;  %s369_s7 = smov 0  }
   0x2   :  { %s371_s8 = smov 0   ;;  %s373_s9 = smov 0  }
   0x3 LB: > { %s229_s10 = sadd.s32 4294967295, %s352_s9   ;;  %s387_s11 = sadd.s32 1, %s352_s9   ;;  %s352_s9 = sphi %s373_s9, %s490_s9   ;;  %s348_s8 = sphi %s371_s8, %s489_s8   ;;  %s344_s7 = sphi %s369_s7, %s488_s7   ;;  %s340_s6 = sphi %s367_s6, %s487_s6  }
   0x4   : > { %s18_s12 = ssub.s32 %s352_s9, %s387_s11  ;;  %s21_s13 = sadd.s32 1, %s348_s8 }
   0x5   : > { %p19_p0 = scmp.eq.s32.totalorder %s18_s12, 0  ;;  %p28_p1 = scmp.ne.s32.totalorder %s348_s8, %s344_s7 }
   0x6   : > { %p29_p2 = scmp.eq.s32.totalorder %s352_s9, 0  ;;  %p34_p3 = scmp.ne.s32.totalorder %s344_s7, %s340_s6 }
   0x7   : > { %s397_s14 = scalar_select %p19_p0, %s348_s8, %s21_s13  }
   0x8   : > { %p30_p4 = por %p29_p2, %p28_p1  ;;  %p35_p5 = scmp.eq.s32.totalorder %s229_s10, 0 }
   0x9   : > { %p253_p6 = scmp.lt.s32.totalorder %s352_s9, 2  ;;  %s84_s16 = sand.u32 1, %s348_s8  }
   0xa   : > { %p402_p7 = por %p35_p5, %p34_p3  ;;  %s233_s17 = sshll.u32 %s84_s16, 6 }
   0xb   : > { %s245_s18 = sshll.u32 %s352_s9, 10  ;;  %s88_s22 = scalar_lea.vmem [#allocation2], %s233_s17 }
   0xc   : > { %s411_s21 = scalar_lea.hbm %s482_s0, %s245_s18  ;;  %s96_s23 = sshll.u32 %s88_s22, 4  ;;  %s413_s23 = int_to_ptr.vmem [resolvable:$true] %s96_s23 }
   0xd   : > { %p415_p8 = pnand %p253_p6, %p30_p4  ;;  %s420_s25 = scalar_lea.sflag [#allocation3], %s84_s16 }
   0xe   : > { %s288_s26 = scalar_lea.hbm %s411_s21, 1024  ;;  %s293_s29 = scalar_lea.hbm %s482_s0, 2048 }
   0xf   : > { %p289_p10 = scmp.ne.s32.totalorder %s411_s21, %s288_s26  ;;  %p290_p11 = pneg %p415_p8 }
  0x10   : > { %p294_p0 = scmp.lt.u32.totalorder %s411_s21, %s482_s0  ;;  %p295_p1 = scmp.lt.u32.totalorder %s293_s29, %s288_s26 }
  0x11   : > { %p291_p12 = pnand %p290_p11, %p289_p10  ;;  %p297_p3 = scmp.lt.u32.totalorder %s288_s26, %s411_s21 }
  0x12   : > { %p296_p2 = por %p295_p1, %p294_p0 }
  0x13   : > { %p292_p13 = pneg %p291_p12 }
  0x14   : > { %p298_p4 = por %p297_p3, %p296_p2 }
  0x16   : > { %p299_p5 = pnand %p298_p4, %p292_p13 }
  0x18   : > { %302 = shalt.err (!%p299_p5)
}
  0x19   : > { %s303_s3 = scalar_lea.vmem %s413_s23, 1024  ;;  %s354_s4 = smov [#allocation2]  }
  0x1a   : > { %p304_p6 = scmp.ne.s32.totalorder %s413_s23, %s303_s3  ;;  %s308_s5 = sshll.u32 %s354_s4, 4  ;;  %s309_s5 = int_to_ptr.vmem [resolvable:$false] %s308_s5 }
  0x1b   : > { %s310_s6 = scalar_lea.vmem %s309_s5, 2048  ;;  %p311_p9 = scmp.lt.s32.totalorder %s413_s23, %s309_s5 }
  0x1c   : > { %p306_p10 = pnand %p304_p6, %p290_p11  ;;  %p312_p0 = scmp.lt.s32.totalorder %s310_s6, %s303_s3 }
  0x1e   : > { %p307_p12 = pneg %p306_p10  ;;  %p313_p1 = por %p312_p0, %p311_p9 }
  0x20   : > { %p314_p2 = pnand %p313_p1, %p307_p12 }
  0x22   : > { %317 = shalt.err (!%p314_p2)
}
  0x23   : > { %s355_s12 = smov 128   ;;  %s356_s13 = smov 8  }
  0x24   : > { %252 = dma.hbm_to_vmem [thread:$0]  (!%p415_p8), %s411_s21, 1024, %s413_s23, %s420_s25, %s355_s12, %s355_s12, %s356_s13  }
  0x25   : > { %p104_p11 = scmp.lt.s32.totalorder %s352_s9, 3  ;;  %p486_p13 = scmp.ge.s32.totalorder %s352_s9, 1 }
  0x27   : > { %p105_p3 = pnand %p486_p13, %p104_p11 }
  0x28   : > { %s110_s16 = sand.u32 (!%p105_p3), 1, %s344_s7  }
  0x29   : > { %108 = sbr.rel (%p105_p3) target bundleno = 59 (0x3b), region = 24  ;;  %s238_s17 = sshll.u32 (!%p105_p3), %s110_s16, 6 }
  0x2a   : > { %s111_s18 = scalar_lea.sflag (!%p105_p3), [#allocation3], %s110_s16  ;;  %s114_s19 = scalar_lea.vmem (!%p105_p3), [#allocation2], %s238_s17 }
  0x30   : > { %335 = dma.done.wait (%p402_p7), %s111_s18, 1024  }
  0x31   : > { %337 = vsyncadd (%p402_p7), %s111_s18, 4294966272  ;;  %s239_s20 = sshll.u32 %s229_s10, 2  ;;  %vm150_vm0 = vcmask 121856   ;;  %vm152_vm1 = vcmask 120832   ;;  %v142_v0 = vld [vmem:[%s114_s19] sm:$0xff]  ;;  %v144_v2 = vld [vmem:[%s114_s19 + $0x10] sm:$0xff] }
  0x32   : > { %p136_p9 = scmp.lt.s32.totalorder %s239_s20, 7  ;;  %v143_v1 = vld [vmem:[%s114_s19 + $0x8] sm:$0x7f]  ;;  %v145_v3 = vld [vmem:[%s114_s19 + $0x18] sm:$0x7f]  ;;  %v146_v4 = vld [vmem:[%s114_s19 + $0x20] sm:$0xff] }
  0x33   : > { %v147_v5 = vld [vmem:[%s114_s19 + $0x28] sm:$0x7f]  ;;  %v148_v6 = vld [vmem:[%s114_s19 + $0x30] sm:$0xff]  ;;  %v149_v7 = vld [vmem:[%s114_s19 + $0x38] sm:$0x7f] }
  0x34   : > { %s492_s20 = smov (!%p136_p9, %s239_s20), 7 }
  0x35   : > { %s246_s21 = sshll.u32 %s492_s20, 4 }
  0x36   : > { %s140_s24 = scalar_lea.vmem %s483_s1, %s246_s21 }
  0x37   : > { %151 = vst.msk [vmem:[%s140_s24] sm:$0xff] %vm150_vm0, %v142_v0  ;;  %154 = vst.msk [vmem:[%s140_s24 + $0x10] sm:$0xff] %vm150_vm0, %v144_v2 }
  0x38   : > { %153 = vst.msk [vmem:[%s140_s24 + $0x8] sm:$0x7f] %vm152_vm1, %v143_v1  ;;  %155 = vst.msk [vmem:[%s140_s24 + $0x18] sm:$0x7f] %vm152_vm1, %v145_v3 }
  0x39   : > { %156 = vst.msk [vmem:[%s140_s24 + $0x20] sm:$0xff] %vm150_vm0, %v146_v4  ;;  %158 = vst.msk [vmem:[%s140_s24 + $0x30] sm:$0xff] %vm150_vm0, %v148_v6 }
  0x3a   : > { %157 = vst.msk [vmem:[%s140_s24 + $0x28] sm:$0x7f] %vm152_vm1, %v147_v5  ;;  %159 = vst.msk [vmem:[%s140_s24 + $0x38] sm:$0x7f] %vm152_vm1, %v149_v7 }
  0x3b PF: > { %p11_p7 = scmp.ge.s32.totalorder %s387_s11, 4   ;;  %s487_s6 = smov %s344_s7 }
  0x3c   : > { %s488_s7 = smov %s348_s8  ;;  %s489_s8 = smov %s397_s14 }
  0x3d   : > { %s490_s9 = smov %s387_s11  ;;  %13 = sbr.rel (!%p11_p7) target bundleno = 3 (0x3), region = 64 }
  0x44   :  { %184 = vsyncpa [#allocation3], 1 }
  0x45   :  { %186 = vsyncpa [#allocation3 + $0x1], 1 }

</bundles_post_ra>
